<compile_context>
chip_gen: v7x
topology: tpu7x:2x2x1
jax: 0.10.0
libtpu: 0.0.40
codegen_flags: <defaults>
</compile_context>

<pallas_src>
import math
import functools

import jax
import jax.numpy as jnp
from jax.experimental import pallas as pl
from jax.experimental.pallas import tpu as pltpu


def model_kernel(emb_ref, w1_ref, b1_ref, w2_ref, b2_ref, w3_ref, b3_ref,
                 mask_ref, out_ref):
    # emb block: (1, 768, S) bf16  -> (768, S)
    emb_cf = emb_ref[0]

    # lin1 (channels-first): (16, 768) @ (768, S) -> (16, S), f32 accumulate.
    l1 = jnp.dot(w1_ref[...], emb_cf,
                 preferred_element_type=jnp.float32) + b1_ref[...]
    # GLU along the feature (sublane) axis: 16 -> 8.
    l2 = l1[:8, :] * jax.nn.sigmoid(l1[8:, :])

    # lin2 (restricted to first 8 input features): (16, 8) @ (8, S) -> (16, S)
    l3 = jnp.dot(w2_ref[...], l2,
                 preferred_element_type=jnp.float32) + b2_ref[...]
    l4 = l3[:8, :] * jax.nn.sigmoid(l3[8:, :])

    # lin3 (restricted to first 8 input features): (2, 8) @ (8, S) -> (2, S)
    l5 = jnp.dot(w3_ref[...], l4,
                 preferred_element_type=jnp.float32) + b3_ref[...]

    # Self-attention with query = key = value = l5 (feature dim = 2).
    dim = l5.shape[0]
    # scores[i, j] = sum_d l5[d, i] * l5[d, j] / sqrt(dim)   -> (S, S)
    scores = jax.lax.dot_general(l5, l5, (((0,), (0,)), ((), ())),
                                 preferred_element_type=jnp.float32)
    scores = scores * (1.0 / math.sqrt(dim)) + mask_ref[...]

    # Softmax over the last (lane) axis.
    m = jnp.max(scores, axis=-1, keepdims=True)
    e = jnp.exp(scores - m)
    denom = jnp.sum(e, axis=-1, keepdims=True)
    p_attn = e * pl.reciprocal(denom, approx=True)

    # l7[d, i] = sum_j l5[d, j] * p_attn[i, j]   -> (2, S)
    l7 = jax.lax.dot_general(l5, p_attn, (((1,), (1,)), ((), ())),
                             preferred_element_type=jnp.float32)

    # Single lane-dense packed store: rows [l7_0, l7_1, l5_0, l5_1] -> (4, S).
    out_ref[0] = jnp.concatenate([l7, l5], axis=0).astype(out_ref.dtype)


@functools.partial(jax.jit)
def model_forward(x1, x2, params):
    """x1: (B, S) int32 token ids, x2: (S, S) float pad-mask source."""
    B, S = x1.shape

    # --- XLA glue ---------------------------------------------------------
    emb_table = params["emb"].astype(jnp.bfloat16)            # (V, 768)
    input_embeds = jnp.take(emb_table, x1, axis=0)            # (B, S, 768) bf16
    emb_cf = jnp.swapaxes(input_embeds, 1, 2)                 # (B, 768, S) bf16

    # Additive pad mask (see notes); dropout is identity in eval mode.
    attn_mask = jnp.where(x2 != 0, -1e9, 0.0).astype(jnp.float32)  # (S, S)

    # Weight prep: bf16 for the big matmul, restrict lin2/lin3 to 8 in-feats.
    w1b = params["w1"].astype(jnp.bfloat16)                   # (16, 768)
    w2e = params["w2"][:, :8]                                 # (16, 8)
    w3e = params["w3"][:, :8]                                 # (2, 8)
    b1c = params["b1"].reshape(-1, 1)                         # (16, 1)
    b2c = params["b2"].reshape(-1, 1)                         # (16, 1)
    b3c = params["b3"].reshape(-1, 1)                         # (2, 1)

    grid_spec = pltpu.PrefetchScalarGridSpec(
        num_scalar_prefetch=0,
        grid=(B,),
        in_specs=[
            pl.BlockSpec((1, 768, S), lambda b: (b, 0, 0)),   # embeddings (cf)
            pl.BlockSpec((16, 768), lambda b: (0, 0)),        # w1 (bf16)
            pl.BlockSpec((16, 1), lambda b: (0, 0)),          # b1
            pl.BlockSpec((16, 8), lambda b: (0, 0)),          # w2 (8 in-feats)
            pl.BlockSpec((16, 1), lambda b: (0, 0)),          # b2
            pl.BlockSpec((2, 8), lambda b: (0, 0)),           # w3 (8 in-feats)
            pl.BlockSpec((2, 1), lambda b: (0, 0)),           # b3
            pl.BlockSpec((S, S), lambda b: (0, 0)),           # attn mask
        ],
        out_specs=pl.BlockSpec((1, 4, S), lambda b: (b, 0, 0)),
    )

    packed = pl.pallas_call(
        model_kernel,
        out_shape=jax.ShapeDtypeStruct((B, 4, S), jnp.float32),
        grid_spec=grid_spec,
        compiler_params=pltpu.CompilerParams(
            dimension_semantics=("parallel",)),
    )(emb_cf, w1b, b1c, w2e, b2c, w3e, b3c, attn_mask)

    # packed rows [l7_0, l7_1, l5_0, l5_1] -> torch.stack([l7, l5], dim=2)
    # i.e. shape (B, S, 2, 2).
    return packed.reshape(B, 2, 2, S).transpose(0, 3, 1, 2)


def init_params(key):
    V, D = 1026, 768
    k = jax.random.split(key, 7)
    params = {
        "emb": jax.random.normal(k[0], (V, D), jnp.float32),
        "w1": jax.random.normal(k[1], (16, D), jnp.float32) * (1.0 / math.sqrt(D)),
        "b1": jax.random.normal(k[2], (16,), jnp.float32) * 0.01,
        "w2": jax.random.normal(k[3], (16, 16), jnp.float32) * 0.25,
        "b2": jax.random.normal(k[4], (16,), jnp.float32) * 0.01,
        "w3": jax.random.normal(k[5], (2, 16), jnp.float32) * 0.25,
        "b3": jax.random.normal(k[6], (2,), jnp.float32) * 0.01,
    }
    return params


if __name__ == "__main__":
    key = jax.random.PRNGKey(0)
    pkey, xkey = jax.random.split(key)
    params = init_params(pkey)

    B, S = 3, 128
    x1 = jax.random.randint(xkey, (B, S), 0, 1026, dtype=jnp.int32)  # token ids
    x2 = jnp.zeros((S, S), jnp.float32)                              # pad-mask source

    out = model_forward(x1, x2, params)
    out = jax.block_until_ready(out)
    assert out.shape == (B, S, 2, 2), out.shape
    assert jnp.isfinite(out).all()
    print("KERNEL_OK")
</pallas_src>

<mosaic_0001>
module attributes {stable_mosaic.version = 11 : i64} {
  func.func @model_kernel(%arg0: i32, %arg1: memref<1x768x128xbf16, #tpu.memory_space<vmem>>, %arg2: memref<16x768xbf16, #tpu.memory_space<vmem>>, %arg3: memref<16x1xf32, #tpu.memory_space<vmem>>, %arg4: memref<16x8xf32, #tpu.memory_space<vmem>>, %arg5: memref<16x1xf32, #tpu.memory_space<vmem>>, %arg6: memref<2x8xf32, #tpu.memory_space<vmem>>, %arg7: memref<2x1xf32, #tpu.memory_space<vmem>>, %arg8: memref<128x128xf32, #tpu.memory_space<vmem>>, %arg9: memref<1x4x128xf32, #tpu.memory_space<vmem>>) attributes {dimension_semantics = [#tpu.dimension_semantics<parallel>], iteration_bounds = array<i64: 3>, scalar_prefetch = 0 : i64, scratch_operands = 0 : i64, tpu.core_type = #tpu.core_type<tc>, window_params = [{transform_indices = @transform_0, window_bounds = array<i64: 1, 768, 128>}, {pipeline_mode = #tpu.pipeline_mode<synchronous>, transform_indices = @transform_1, window_bounds = array<i64: 16, 768>}, {pipeline_mode = #tpu.pipeline_mode<synchronous>, transform_indices = @transform_2, window_bounds = array<i64: 16, 1>}, {pipeline_mode = #tpu.pipeline_mode<synchronous>, transform_indices = @transform_3, window_bounds = array<i64: 16, 8>}, {pipeline_mode = #tpu.pipeline_mode<synchronous>, transform_indices = @transform_4, window_bounds = array<i64: 16, 1>}, {pipeline_mode = #tpu.pipeline_mode<synchronous>, transform_indices = @transform_5, window_bounds = array<i64: 2, 8>}, {pipeline_mode = #tpu.pipeline_mode<synchronous>, transform_indices = @transform_6, window_bounds = array<i64: 2, 1>}, {pipeline_mode = #tpu.pipeline_mode<synchronous>, transform_indices = @transform_7, window_bounds = array<i64: 128, 128>}, {transform_indices = @transform_8, window_bounds = array<i64: 1, 4, 128>}]} {
    %c0 = arith.constant 0 : index
    %c0_0 = arith.constant 0 : index
    %c0_1 = arith.constant 0 : index
    %0 = vector.load %arg1[%c0, %c0_0, %c0_1] : memref<1x768x128xbf16, #tpu.memory_space<vmem>>, vector<1x768x128xbf16>
    %1 = vector.shape_cast %0 : vector<1x768x128xbf16> to vector<768x128xbf16>
    %c0_2 = arith.constant 0 : index
    %c0_3 = arith.constant 0 : index
    %2 = vector.load %arg2[%c0_2, %c0_3] : memref<16x768xbf16, #tpu.memory_space<vmem>>, vector<16x768xbf16>
    %cst = arith.constant dense<0.000000e+00> : vector<16x128xf32>
    %3 = tpu.matmul %2, %1, %cst {dimension_numbers = #tpu.dot_dimension_numbers<[1], [0], [0], [1], [0, 0, 1, 1], [], []>} : vector<16x768xbf16>, vector<768x128xbf16>, vector<16x128xf32> -> vector<16x128xf32>
    %c0_4 = arith.constant 0 : index
    %c0_5 = arith.constant 0 : index
    %4 = vector.load %arg3[%c0_4, %c0_5] : memref<16x1xf32, #tpu.memory_space<vmem>>, vector<16x1xf32>
    %5 = vector.broadcast %4 : vector<16x1xf32> to vector<16x128xf32>
    %6 = arith.addf %3, %5 : vector<16x128xf32>
    %7 = vector.extract_strided_slice %6 {offsets = [0, 0], sizes = [8, 128], strides = [1, 1]} : vector<16x128xf32> to vector<8x128xf32>
    %8 = vector.extract_strided_slice %6 {offsets = [8, 0], sizes = [8, 128], strides = [1, 1]} : vector<16x128xf32> to vector<8x128xf32>
    %9 = arith.negf %8 : vector<8x128xf32>
    %10 = math.exp %9 : vector<8x128xf32>
    %cst_6 = arith.constant 1.000000e+00 : f32
    %11 = vector.broadcast %cst_6 : f32 to vector<8x128xf32>
    %12 = arith.addf %11, %10 : vector<8x128xf32>
    %13 = arith.divf %11, %12 : vector<8x128xf32>
    %14 = arith.mulf %7, %13 : vector<8x128xf32>
    %c0_7 = arith.constant 0 : index
    %c0_8 = arith.constant 0 : index
    %15 = vector.load %arg4[%c0_7, %c0_8] : memref<16x8xf32, #tpu.memory_space<vmem>>, vector<16x8xf32>
    %cst_9 = arith.constant dense<0.000000e+00> : vector<16x128xf32>
    %16 = tpu.matmul %15, %14, %cst_9 {dimension_numbers = #tpu.dot_dimension_numbers<[1], [0], [0], [1], [0, 0, 1, 1], [], []>} : vector<16x8xf32>, vector<8x128xf32>, vector<16x128xf32> -> vector<16x128xf32>
    %c0_10 = arith.constant 0 : index
    %c0_11 = arith.constant 0 : index
    %17 = vector.load %arg5[%c0_10, %c0_11] : memref<16x1xf32, #tpu.memory_space<vmem>>, vector<16x1xf32>
    %18 = vector.broadcast %17 : vector<16x1xf32> to vector<16x128xf32>
    %19 = arith.addf %16, %18 : vector<16x128xf32>
    %20 = vector.extract_strided_slice %19 {offsets = [0, 0], sizes = [8, 128], strides = [1, 1]} : vector<16x128xf32> to vector<8x128xf32>
    %21 = vector.extract_strided_slice %19 {offsets = [8, 0], sizes = [8, 128], strides = [1, 1]} : vector<16x128xf32> to vector<8x128xf32>
    %22 = arith.negf %21 : vector<8x128xf32>
    %23 = math.exp %22 : vector<8x128xf32>
    %cst_12 = arith.constant 1.000000e+00 : f32
    %24 = vector.broadcast %cst_12 : f32 to vector<8x128xf32>
    %25 = arith.addf %24, %23 : vector<8x128xf32>
    %26 = arith.divf %24, %25 : vector<8x128xf32>
    %27 = arith.mulf %20, %26 : vector<8x128xf32>
    %c0_13 = arith.constant 0 : index
    %c0_14 = arith.constant 0 : index
    %28 = vector.load %arg6[%c0_13, %c0_14] : memref<2x8xf32, #tpu.memory_space<vmem>>, vector<2x8xf32>
    %cst_15 = arith.constant dense<0.000000e+00> : vector<2x128xf32>
    %29 = tpu.matmul %28, %27, %cst_15 {dimension_numbers = #tpu.dot_dimension_numbers<[1], [0], [0], [1], [0, 0, 1, 1], [], []>} : vector<2x8xf32>, vector<8x128xf32>, vector<2x128xf32> -> vector<2x128xf32>
    %c0_16 = arith.constant 0 : index
    %c0_17 = arith.constant 0 : index
    %30 = vector.load %arg7[%c0_16, %c0_17] : memref<2x1xf32, #tpu.memory_space<vmem>>, vector<2x1xf32>
    %31 = vector.broadcast %30 : vector<2x1xf32> to vector<2x128xf32>
    %32 = arith.addf %29, %31 : vector<2x128xf32>
    %cst_18 = arith.constant dense<0.000000e+00> : vector<128x128xf32>
    %33 = tpu.matmul %32, %32, %cst_18 {dimension_numbers = #tpu.dot_dimension_numbers<[0], [0], [1], [1], [0, 1, 1, 1], [], []>} : vector<2x128xf32>, vector<2x128xf32>, vector<128x128xf32> -> vector<128x128xf32>
    %cst_19 = arith.constant 0.707106769 : f32
    %34 = vector.broadcast %cst_19 : f32 to vector<128x128xf32>
    %35 = arith.mulf %33, %34 : vector<128x128xf32>
    %c0_20 = arith.constant 0 : index
    %c0_21 = arith.constant 0 : index
    %36 = vector.load %arg8[%c0_20, %c0_21] : memref<128x128xf32, #tpu.memory_space<vmem>>, vector<128x128xf32>
    %37 = arith.addf %35, %36 : vector<128x128xf32>
    %cst_22 = arith.constant dense<0xFF800000> : vector<128xf32>
    %38 = vector.multi_reduction <maximumf>, %37, %cst_22 [1] : vector<128x128xf32> to vector<128xf32>
    %39 = vector.shape_cast %38 : vector<128xf32> to vector<128x1xf32>
    %40 = vector.broadcast %39 : vector<128x1xf32> to vector<128x128xf32>
    %41 = arith.subf %37, %40 : vector<128x128xf32>
    %42 = math.exp %41 : vector<128x128xf32>
    %cst_23 = arith.constant dense<0.000000e+00> : vector<128xf32>
    %43 = vector.multi_reduction <add>, %42, %cst_23 [1] : vector<128x128xf32> to vector<128xf32>
    %44 = vector.shape_cast %43 : vector<128xf32> to vector<128x1xf32>
    %45 = tpu.reciprocal %44 {approx = true} : vector<128x1xf32> -> vector<128x1xf32>
    %46 = vector.broadcast %45 : vector<128x1xf32> to vector<128x128xf32>
    %47 = arith.mulf %42, %46 : vector<128x128xf32>
    %cst_24 = arith.constant dense<0.000000e+00> : vector<2x128xf32>
    %48 = tpu.matmul %32, %47, %cst_24 {dimension_numbers = #tpu.dot_dimension_numbers<[1], [1], [0], [0], [0, 0, 1, 0], [], []>} : vector<2x128xf32>, vector<128x128xf32>, vector<2x128xf32> -> vector<2x128xf32>
    %49 = tpu.concatenate %48, %32 in 0 : vector<2x128xf32>, vector<2x128xf32> -> vector<4x128xf32>
    %c0_25 = arith.constant 0 : index
    %c0_26 = arith.constant 0 : index
    %c0_27 = arith.constant 0 : index
    %50 = vector.load %arg9[%c0_25, %c0_26, %c0_27] : memref<1x4x128xf32, #tpu.memory_space<vmem>>, vector<1x4x128xf32>
    %51 = vector.shape_cast %50 : vector<1x4x128xf32> to vector<4x128xf32>
    %52 = vector.shape_cast %49 : vector<4x128xf32> to vector<1x4x128xf32>
    tpu.vector_store %arg9[%c0_25, %c0_26, %c0_27], %52 {strides = array<i32>} : memref<1x4x128xf32, #tpu.memory_space<vmem>>, vector<1x4x128xf32>,
    return
  }
  func.func @transform_0(%arg0: i32) -> (i32, i32, i32) {
    %c0_i32 = arith.constant 0 : i32
    %c0_i32_0 = arith.constant 0 : i32
    %c0_i32_1 = arith.constant 0 : i32
    return %arg0, %c0_i32, %c0_i32_0 : i32, i32, i32
  }
  func.func @transform_1(%arg0: i32) -> (i32, i32) {
    %c0_i32 = arith.constant 0 : i32
    %c0_i32_0 = arith.constant 0 : i32
    %c0_i32_1 = arith.constant 0 : i32
    return %c0_i32, %c0_i32_0 : i32, i32
  }
  func.func @transform_2(%arg0: i32) -> (i32, i32) {
    %c0_i32 = arith.constant 0 : i32
    %c0_i32_0 = arith.constant 0 : i32
    %c0_i32_1 = arith.constant 0 : i32
    return %c0_i32, %c0_i32_0 : i32, i32
  }
  func.func @transform_3(%arg0: i32) -> (i32, i32) {
    %c0_i32 = arith.constant 0 : i32
    %c0_i32_0 = arith.constant 0 : i32
    %c0_i32_1 = arith.constant 0 : i32
    return %c0_i32, %c0_i32_0 : i32, i32
  }
  func.func @transform_4(%arg0: i32) -> (i32, i32) {
    %c0_i32 = arith.constant 0 : i32
    %c0_i32_0 = arith.constant 0 : i32
    %c0_i32_1 = arith.constant 0 : i32
    return %c0_i32, %c0_i32_0 : i32, i32
  }
  func.func @transform_5(%arg0: i32) -> (i32, i32) {
    %c0_i32 = arith.constant 0 : i32
    %c0_i32_0 = arith.constant 0 : i32
    %c0_i32_1 = arith.constant 0 : i32
    return %c0_i32, %c0_i32_0 : i32, i32
  }
  func.func @transform_6(%arg0: i32) -> (i32, i32) {
    %c0_i32 = arith.constant 0 : i32
    %c0_i32_0 = arith.constant 0 : i32
    %c0_i32_1 = arith.constant 0 : i32
    return %c0_i32, %c0_i32_0 : i32, i32
  }
  func.func @transform_7(%arg0: i32) -> (i32, i32) {
    %c0_i32 = arith.constant 0 : i32
    %c0_i32_0 = arith.constant 0 : i32
    %c0_i32_1 = arith.constant 0 : i32
    return %c0_i32, %c0_i32_0 : i32, i32
  }
  func.func @transform_8(%arg0: i32) -> (i32, i32, i32) {
    %c0_i32 = arith.constant 0 : i32
    %c0_i32_0 = arith.constant 0 : i32
    %c0_i32_1 = arith.constant 0 : i32
    return %arg0, %c0_i32, %c0_i32_0 : i32, i32, i32
  }
}

</mosaic_0001>

<bundles_post_ra>
// kernel: model_forward.1
= control target key start
LH: loop header
LB: loop body
LE: loop exit
PB: predicated region body
PF: predicated region fallthrough
CT: control target
= control target key end

     0   :  { %13 = vsyncpa [#allocation3], 0  ;;  %s2601_s0 = inlined_call_operand.vmem [shape: bf16[3,768,128], index: 0, kind: input, shape index: {}]   ;;  %s2602_s1 = inlined_call_operand.vmem [shape: bf16[16,768], index: 1, kind: input, shape index: {}]   ;;  %s2603_s2 = inlined_call_operand.vmem [shape: f32[16,1], index: 2, kind: input, shape index: {}]   ;;  %s2604_s3 = inlined_call_operand.vmem [shape: f32[16,8], index: 3, kind: input, shape index: {}]   ;;  %s2605_s4 = inlined_call_operand.vmem [shape: f32[16,1], index: 4, kind: input, shape index: {}]   ;;  %s2606_s5 = inlined_call_operand.vmem [shape: f32[2,8], index: 5, kind: input, shape index: {}]   ;;  %s2607_s6 = inlined_call_operand.vmem [shape: f32[2,1], index: 6, kind: input, shape index: {}]   ;;  %s2608_s7 = inlined_call_operand.vmem [shape: f32[128,128], index: 7, kind: input, shape index: {}]   ;;  %s2609_s8 = inlined_call_operand.hbm [shape: f32[3,4,128], index: 8, kind: output, shape index: {}]  }
   0x1   :  { %15 = vsyncpa [#allocation3 + $0x1], 0  ;;  %s2194_s27 = smov 0   ;;  %s2196_s28 = smov 0  }
   0x2   :  { %s2198_s29 = smov 0   ;;  %s2200_s30 = smov 0  }
   0x3 LB: > { %s2215_s9 = sadd.s32 4294967295, %s2142_s30   ;;  %s1619_s10 = sadd.s32 4294967294, %s2142_s30   ;;  %s2142_s30 = sphi %s2200_s30, %s2615_s30   ;;  %s2138_s29 = sphi %s2198_s29, %s2614_s29   ;;  %s2134_s28 = sphi %s2196_s28, %s2613_s28   ;;  %s2130_s27 = sphi %s2194_s27, %s2612_s27  }
   0x4   : > { %s2219_s11 = sadd.s32 1, %s2142_s30   ;;  %s201_s12 = sadd.s32 1, %s2138_s29 }
   0x5   : > { %s198_s13 = ssub.s32 %s2142_s30, %s2219_s11  ;;  %p211_p0 = scmp.ne.s32.totalorder %s2138_s29, %s2134_s28 }
   0x6   : > { %p199_p1 = scmp.eq.s32.totalorder %s198_s13, 0  ;;  %p212_p2 = scmp.eq.s32.totalorder %s2215_s9, 2 }
   0x7   : > { %p217_p3 = scmp.ne.s32.totalorder %s2134_s28, %s2130_s27  ;;  %p218_p4 = scmp.eq.s32.totalorder %s1619_s10, 2 }
   0x8   : > { %s2230_s14 = scalar_select %p199_p1, %s2138_s29, %s201_s12  }
   0x9   : > { %p2232_p5 = por %p212_p2, %p211_p0  ;;  %p2236_p6 = por %p218_p4, %p217_p3 }
   0xa   : > { %p1622_p7 = scmp.ge.s32.totalorder %s2142_s30, 1  ;;  %p265_p8 = scmp.lt.s32.totalorder %s2142_s30, 4 }
   0xc   : > { %p266_p9 = pnand %p1622_p7, %p265_p8 }
   0xd   : > { %p299_p10 = scmp.lt.s32.totalorder (!%p266_p9), %s2215_s9, 2  ;;  %v1969_v0 = vld [vmem:[%s2602_s1 + $0x4] ss:$24 sps:$4 sm:$0xff] (!%p266_p9)   ;;  %v2144_v1 = vmov (!%p266_p9), 0   ;;  %v408_v2 = vld [vmem:[%s2603_s2 + $0x8] sm:$0xff] (!%p266_p9)  ;;  %vm881_vm0 = vcmask (!%p266_p9), 64512  }
   0xe   : > { %269 = sbr.rel (%p266_p9) target bundleno = 1791 (0x6ff), region = 52  ;;  %1949 = vset.pattern.permute.xlu0 (!%p266_p9), %v2144_v1  ;;  %1950 = vset.pattern.permute.xlu1 (!%p266_p9), %v2144_v1  ;;  %v407_v3 = vld [vmem:[%s2603_s2] sm:$0xff] (!%p266_p9)  ;;  %v2007_v42 = vld [vmem:[%s2602_s1 + $0x14] ss:$24 sps:$4 sm:$0xff] (!%p266_p9)   ;;  %v2005_v57 = vld [vmem:[%s2602_s1 + $0x10] ss:$24 sps:$4 sm:$0xff] (!%p266_p9)  }
   0xf   : > { %769 = vmatprep.mubr.bf16.mxu0 (!%p266_p9), %v1969_v0  ;;  %416 = vperm.xlu0 (!%p266_p9), %1949, %v408_v2   ;;  %v971_v6 = vld [vmem:[%s2607_s6] sm:$0x3] (!%p266_p9)  ;;  %v1988_v23 = vld [vmem:[%s2602_s1 + $0xc] ss:$24 sps:$4 sm:$0xff] (!%p266_p9)   ;;  %vm2146_vm1 = vmmov (!%p266_p9), 0   ;;  %vm1131_vm2 = vcmask (!%p266_p9), 1041408  }
  0x10   : > { %v1967_v22 = vld [vmem:[%s2602_s1] ss:$24 sps:$4 sm:$0xff] (!%p266_p9)   ;;  %v870_v59 = vld [vmem:[%s2605_s4 + $0x8] sm:$0xff] (!%p266_p9)  ;;  %vm1082_vm3 = vcmask (!%p266_p9), 15360   ;;  %s296_s18 = sand.u32 (!%p266_p9), 1, %s2134_s28   ;;  %s2148_s10 = smov (!%p266_p9), [#allocation2]  }
  0x11   : > { %v1986_v40 = vld [vmem:[%s2602_s1 + $0x8] ss:$24 sps:$4 sm:$0xff] (!%p266_p9)   ;;  %878 = vperm.xlu1 (!%p266_p9), %1950, %v870_v59   ;;  %s2084_s12 = sshll.u32 (!%p266_p9), %s2148_s10, 4  ;;  %s2085_s12 = int_to_ptr.vmem [resolvable:$false] %s2084_s12 }
  0x12   : > { %v867_v58 = vld [vmem:[%s2604_s3] sm:$0xff] (!%p266_p9)  ;;  %s2086_s13 = scalar_lea.vmem (!%p266_p9), %s2085_s12, 128 }
  0x13   : > { %411 = vperm.xlu0 (!%p266_p9), %1949, %v407_v3   ;;  %1812 = vmatprep.mubr.msk.f32.mxu1 (!%p266_p9), %vm881_vm0, %v867_v58  ;;  %v869_v60 = vld [vmem:[%s2605_s4] sm:$0xff] (!%p266_p9) }
  0x15   : > { %s300_s19 = scalar_select %p299_p10, %s2215_s9, 2  ;;  %873 = vperm.xlu1 %1950, %v869_v60  }
  0x17   : > { %s1905_s20 = smul.u32 384, %s300_s19  ;;  %974 = vperm.xlu0 %1949, %v971_v6   ;;  %s1702_s19 = sshll.u32 %s2215_s9, 6 }
  0x18   : > { %s2558_s24 = scalar_lea.hbm %s2609_s8, %s1702_s19  ;;  %s1547_s9 = scalar_lea.sflag [#allocation3], %s296_s18 }
  0x19   : > { %s2253_s25 = scalar_lea.vmem %s2601_s0, %s1905_s20 }
  0x1a   : > { %v1951_v4 = vld [vmem:[%s2253_s25 + $0x40] sm:$0xff]   ;;  %v1953_v7 = vld [vmem:[%s2253_s25 + $0x48] sm:$0xff]   ;;  %v1955_v9 = vld [vmem:[%s2253_s25 + $0x50] sm:$0xff]  }
  0x1b   : > { %v1952_v5 = vld [vmem:[%s2253_s25] sm:$0xff]   ;;  %1705 = vmatprep.subr.bf16.mxu0 %v1951_v4  ;;  %v1954_v8 = vld [vmem:[%s2253_s25 + $0x8] sm:$0xff]   ;;  %v1956_v10 = vld [vmem:[%s2253_s25 + $0x10] sm:$0xff]  }
  0x1c   : > { %1706 = vmatpush3.bf16.msra.mxu0 %v1952_v5  ;;  %v1957_v11 = vld [vmem:[%s2253_s25 + $0x58] sm:$0xff]   ;;  %v1959_v13 = vld [vmem:[%s2253_s25 + $0x60] sm:$0xff]   ;;  %v1961_v15 = vld [vmem:[%s2253_s25 + $0x68] sm:$0xff]  }
  0x1d   : > { %1707 = vmatprep.subr.bf16.mxu0 %v1953_v7  ;;  %v1958_v12 = vld [vmem:[%s2253_s25 + $0x18] sm:$0xff]   ;;  %v1960_v14 = vld [vmem:[%s2253_s25 + $0x20] sm:$0xff]   ;;  %v1962_v16 = vld [vmem:[%s2253_s25 + $0x28] sm:$0xff]  }
  0x1e   : > { %v1963_v17 = vld [vmem:[%s2253_s25 + $0x70] sm:$0xff]   ;;  %v1965_v19 = vld [vmem:[%s2253_s25 + $0x78] sm:$0xff]   ;;  %v1970_v21 = vld [vmem:[%s2253_s25 + $0xc0] sm:$0xff]  }
  0x1f   : > { %v1964_v18 = vld [vmem:[%s2253_s25 + $0x30] sm:$0xff]   ;;  %v1966_v20 = vld [vmem:[%s2253_s25 + $0x38] sm:$0xff]   ;;  %v1971_v24 = vld [vmem:[%s2253_s25 + $0x80] sm:$0xff]  }
  0x20   : > { %1708 = vmatpush3.bf16.msra.mxu0 %v1954_v8  ;;  %v1972_v25 = vld [vmem:[%s2253_s25 + $0xc8] sm:$0xff]   ;;  %v1974_v27 = vld [vmem:[%s2253_s25 + $0xd0] sm:$0xff]   ;;  %v1976_v29 = vld [vmem:[%s2253_s25 + $0xd8] sm:$0xff]  }
  0x21   : > { %1709 = vmatprep.subr.bf16.mxu0 %v1955_v9  ;;  %v1973_v26 = vld [vmem:[%s2253_s25 + $0x88] sm:$0xff]   ;;  %v1975_v28 = vld [vmem:[%s2253_s25 + $0x90] sm:$0xff]   ;;  %v1977_v30 = vld [vmem:[%s2253_s25 + $0x98] sm:$0xff]  }
  0x22   : > { %v1978_v31 = vld [vmem:[%s2253_s25 + $0xe0] sm:$0xff]   ;;  %v1980_v33 = vld [vmem:[%s2253_s25 + $0xe8] sm:$0xff]   ;;  %v1982_v35 = vld [vmem:[%s2253_s25 + $0xf0] sm:$0xff]  }
  0x23   : > { %v1979_v32 = vld [vmem:[%s2253_s25 + $0xa0] sm:$0xff]   ;;  %v1981_v34 = vld [vmem:[%s2253_s25 + $0xa8] sm:$0xff]   ;;  %v1983_v36 = vld [vmem:[%s2253_s25 + $0xb0] sm:$0xff]  }
  0x24   : > { %1710 = vmatpush3.bf16.msra.mxu0 %v1956_v10  ;;  %v1984_v37 = vld [vmem:[%s2253_s25 + $0xf8] sm:$0xff]   ;;  %v1989_v39 = vld [vmem:[%s2253_s25 + $0x140] sm:$0xff]   ;;  %v1991_v43 = vld [vmem:[%s2253_s25 + $0x148] sm:$0xff]  }
  0x25   : > { %1711 = vmatprep.subr.bf16.mxu0 %v1957_v11  ;;  %v1985_v38 = vld [vmem:[%s2253_s25 + $0xb8] sm:$0xff]   ;;  %v1990_v41 = vld [vmem:[%s2253_s25 + $0x100] sm:$0xff]   ;;  %v1992_v44 = vld [vmem:[%s2253_s25 + $0x108] sm:$0xff]  }
  0x26   : > { %v1993_v45 = vld [vmem:[%s2253_s25 + $0x150] sm:$0xff]   ;;  %v1995_v47 = vld [vmem:[%s2253_s25 + $0x158] sm:$0xff]   ;;  %v1997_v49 = vld [vmem:[%s2253_s25 + $0x160] sm:$0xff]  }
  0x27   : > { %v1994_v46 = vld [vmem:[%s2253_s25 + $0x110] sm:$0xff]   ;;  %v1996_v48 = vld [vmem:[%s2253_s25 + $0x118] sm:$0xff]   ;;  %v1998_v50 = vld [vmem:[%s2253_s25 + $0x120] sm:$0xff]  }
  0x28   : > { %1712 = vmatpush3.bf16.msra.mxu0 %v1958_v12  ;;  %v1999_v51 = vld [vmem:[%s2253_s25 + $0x168] sm:$0xff]   ;;  %v2001_v53 = vld [vmem:[%s2253_s25 + $0x170] sm:$0xff]   ;;  %v2003_v55 = vld [vmem:[%s2253_s25 + $0x178] sm:$0xff]  }
  0x29   : > { %1713 = vmatprep.subr.bf16.mxu0 %v1959_v13  ;;  %v2000_v52 = vld [vmem:[%s2253_s25 + $0x128] sm:$0xff]   ;;  %v2002_v54 = vld [vmem:[%s2253_s25 + $0x130] sm:$0xff]   ;;  %v2004_v56 = vld [vmem:[%s2253_s25 + $0x138] sm:$0xff]   ;;  %s1623_s25 = sshll.u32 %s296_s18, 2 }
  0x2a   : > { %s298_s20 = scalar_lea.vmem [#allocation2], %s1623_s25 }
  0x2b   : > { %s1560_s21 = sshll.u32 %s298_s20, 4  ;;  %s2560_s21 = int_to_ptr.vmem [resolvable:$true] %s1560_s21 }
  0x2c   : > { %1714 = vmatpush3.bf16.msra.mxu0 %v1960_v14  ;;  %s2080_s26 = scalar_lea.vmem %s2560_s21, 64  ;;  %p2087_p0 = scmp.lt.s32.totalorder %s2560_s21, %s2085_s12 }
  0x2d   : > { %1715 = vmatprep.subr.bf16.mxu0 %v1961_v15  ;;  %p2081_p11 = scmp.ne.s32.totalorder %s2560_s21, %s2080_s26  ;;  %p2088_p1 = scmp.lt.s32.totalorder %s2086_s13, %s2080_s26 }
  0x2f   : > { %p2082_p12 = pnand %p2081_p11, %p2232_p5  ;;  %p2089_p2 = por %p2088_p1, %p2087_p0 }
  0x30   : > { %1716 = vmatpush3.bf16.msra.mxu0 %v1962_v16 }
  0x31   : > { %1717 = vmatprep.subr.bf16.mxu0 %v1963_v17  ;;  %p2083_p13 = pneg %p2082_p12 }
  0x33   : > { %p2090_p3 = pnand %p2089_p2, %p2083_p13 }
  0x34   : > { %1718 = vmatpush3.bf16.msra.mxu0 %v1964_v18 }
  0x35   : > { %1719 = vmatprep.subr.bf16.mxu0 %v1965_v19 }
  0x38   : > { %1720 = vmatpush3.bf16.msra.mxu0 %v1966_v20 }
  0x39   : > { %1727 = vmatprep.subr.bf16.mxu0 %v1970_v21 }
  0x3b   : > { %770 = vmatmul.mubr.bf16.vlgmr.msra.gmra.mrb[0].mxu0 %v1967_v22 }
  0x3c   : > { %1728 = vmatpush3.bf16.msra.mxu0 %v1971_v24  ;;  %810 = vmatprep.mubr.bf16.mxu0 %v1988_v23 }
  0x3d   : > { %1729 = vmatprep.subr.bf16.mxu0 %v1972_v25 }
  0x40   : > { %1730 = vmatpush3.bf16.msra.mxu0 %v1973_v26 }
  0x41   : > { %1731 = vmatprep.subr.bf16.mxu0 %v1974_v27 }
  0x44   : > { %1732 = vmatpush3.bf16.msra.mxu0 %v1975_v28  ;;  %v868_v28 = vld [vmem:[%s2604_s3 + $0x8] sm:$0xff] }
  0x45   : > { %1733 = vmatprep.subr.bf16.mxu0 %v1976_v29  ;;  %v2145_v29 = vmov 0.0  }
  0x48   : > { %1734 = vmatpush3.bf16.msra.mxu0 %v1977_v30 }
  0x49   : > { %1735 = vmatprep.subr.bf16.mxu0 %v1978_v31 }
  0x4c   : > { %1736 = vmatpush3.bf16.msra.mxu0 %v1979_v32 }
  0x4d   : > { %1737 = vmatprep.subr.bf16.mxu0 %v1980_v33 }
  0x50   : > { %1738 = vmatpush3.bf16.msra.mxu0 %v1981_v34 }
  0x51   : > { %1739 = vmatprep.subr.bf16.mxu0 %v1982_v35 }
  0x54   : > { %1740 = vmatpush3.bf16.msra.mxu0 %v1983_v36 }
  0x55   : > { %1741 = vmatprep.subr.bf16.mxu0 %v1984_v37 }
  0x58   : > { %1742 = vmatpush3.bf16.msra.mxu0 %v1985_v38 }
  0x59   : > { %1749 = vmatprep.subr.bf16.mxu0 %v1989_v39 }
  0x5b   : > { %811 = vmatmul.mubr.bf16.vlgmr.msra.gmra.mrb[4].mxu0 %v1986_v40 }
  0x5c   : > { %1750 = vmatpush3.bf16.msra.mxu0 %v1990_v41  ;;  %851 = vmatprep.mubr.bf16.mxu0 %v2007_v42  ;;  %v970_v41 = vld [vmem:[%s2606_s5] sm:$0x3] }
  0x5d   : > { %1751 = vmatprep.subr.bf16.mxu0 %v1991_v43 }
  0x60   : > { %1752 = vmatpush3.bf16.msra.mxu0 %v1992_v44 }
  0x61   : > { %1753 = vmatprep.subr.bf16.mxu0 %v1993_v45 }
  0x64   : > { %1754 = vmatpush3.bf16.msra.mxu0 %v1994_v46 }
  0x65   : > { %1755 = vmatprep.subr.bf16.mxu0 %v1995_v47 }
  0x68   : > { %1756 = vmatpush3.bf16.msra.mxu0 %v1996_v48 }
  0x69   : > { %1757 = vmatprep.subr.bf16.mxu0 %v1997_v49 }
  0x6c   : > { %1758 = vmatpush3.bf16.msra.mxu0 %v1998_v50 }
  0x6d   : > { %1759 = vmatprep.subr.bf16.mxu0 %v1999_v51 }
  0x70   : > { %1760 = vmatpush3.bf16.msra.mxu0 %v2000_v52 }
  0x71   : > { %1761 = vmatprep.subr.bf16.mxu0 %v2001_v53 }
  0x74   : > { %1762 = vmatpush3.bf16.msra.mxu0 %v2002_v54 }
  0x75   : > { %1763 = vmatprep.subr.bf16.mxu0 %v2003_v55 }
  0x78   : > { %1764 = vmatpush3.bf16.msra.mxu0 %v2004_v56 }
  0x7b   : > { %852 = vmatmul.mubr.bf16.vlgmr.msra.gmra.mrb[8].mxu0 %v2005_v57 }
  0x8e   : > { %v417_v3 = vpop.permute.xlu0 %416 }
  0x90   : > { %v879_v30 = vpop.permute.xlu1 %878 }
  0x92   : > { %v412_v4 = vpop.permute.xlu0 %411 }
  0x94   : > { %v874_v37 = vpop.permute.xlu1 %873 }
  0x96   : > { %v975_v42 = vpop.permute.xlu0 %974 }
 0x10e   : > { %v1721_v61 = vpop.f32.mrb[0].mxu0 }
 0x10f   : > { %v1722_v62 = vpop.f32.mrb[1].mxu0 }
 0x110   : > { %v1723_v63 = vadd.f32 %v1722_v62, %v1721_v61  ;;  %v1724_v0 = vpop.f32.mrb[2].mxu0 }
 0x111   : > { %v1725_v1 = vpop.f32.mrb[3].mxu0 }
 0x112   : > { %v1726_v2 = vadd.f32 %v1725_v1, %v1724_v0  ;;  %v772_v7 = vadd.f32 %v1723_v63, %v412_v4  ;;  %v1296_v0 = vld [vmem:[%s2608_s7] sm:$0xff]  ;;  %v1297_v4 = vld [vmem:[%s2608_s7 + $0x8] sm:$0xff] }
 0x114   : > { %v775_v11 = vadd.f32 %v1726_v2, %v417_v3 }
 0x12e   : > { %v1743_v5 = vpop.f32.mrb[4].mxu0 }
 0x12f   : > { %v1744_v6 = vpop.f32.mrb[5].mxu0 }
 0x130   : > { %v1745_v8 = vadd.f32 %v1744_v6, %v1743_v5  ;;  %v1746_v9 = vpop.f32.mrb[6].mxu0 }
 0x131   : > { %v1747_v10 = vpop.f32.mrb[7].mxu0 }
 0x132   : > { %v813_v12 = vadd.f32 %v1745_v8, %v772_v7  ;;  %v1748_v13 = vadd.f32 %v1747_v10, %v1746_v9  ;;  %v1299_v7 = vld [vmem:[%s2608_s7 + $0x18] sm:$0xff]  ;;  %v1298_v10 = vld [vmem:[%s2608_s7 + $0x10] sm:$0xff] }
 0x134   : > { %v816_v14 = vadd.f32 %v1748_v13, %v775_v11 }
 0x14e   : > { %v1765_v15 = vpop.f32.mrb[8].mxu0 }
 0x14f   : > { %v1766_v16 = vpop.f32.mrb[9].mxu0 }
 0x150   : > { %v1767_v17 = vadd.f32 %v1766_v16, %v1765_v15  ;;  %v1768_v18 = vpop.f32.mrb[10].mxu0  ;;  %v1301_v15 = vld [vmem:[%s2608_s7 + $0x28] sm:$0xff] }
 0x151   : > { %v1769_v19 = vpop.f32.mrb[11].mxu0 }
 0x152   : > { %v854_v20 = vadd.f32 %v1767_v17, %v813_v12  ;;  %v1770_v21 = vadd.f32 %v1769_v19, %v1768_v18 }
 0x154   : > { %v857_v22 = vadd.f32 %v1770_v21, %v816_v14 }
 0x156   : > { %v1679_v23 = vmul.f32 -1.442695, %v857_v22 }
 0x158   : > { %2008 = vpow2.f32 %v1679_v23  ;;  %v1303_v23 = vld [vmem:[%s2608_s7 + $0x38] sm:$0xff] }
 0x162   : > { %v2009_v24 = vpop.eup %2008 }
 0x163   : > { %v863_v25 = vadd.f32 1.0, %v2009_v24 }
 0x165   : > { %2010 = vrcp.f32 %v863_v25 }
 0x16f   : > { %v2011_v26 = vpop.eup %2010 }
 0x170   : > { %v866_v27 = vmul.f32 %v2011_v26, %v854_v20  ;;  %v1300_v20 = vld [vmem:[%s2608_s7 + $0x20] sm:$0xff] }
 0x172   : > { %1810 = vmatprep.subr.mxu1 %v866_v27 }
 0x173   : > { %1811 = vmatpush3.msra.mxu1 %v866_v27 }
 0x174   : > { %1813 = vmatmul.mubr.msk.f32.vlgmr.msra.gmra.mrb[0].mxu1 %vm881_vm0, %v868_v28  ;;  %1815 = vmatprep.subr.mxu1 %v2145_v29  ;;  %v1302_v28 = vld [vmem:[%s2608_s7 + $0x30] sm:$0xff] }
 0x175   : > { %1817 = vmatprep.mubr.msk.f32.mxu1 %vm2146_vm1, %v2145_v29 }
 0x247   : > { %v1814_v31 = vpop.f32.mrb[0].mxu1 }
 0x248   : > { %v960_v32 = vadd.f32 %v1814_v31, %v879_v30  ;;  %v954_v33 = vpop.f32.mrb[1].mxu1  ;;  %v1305_v31 = vld [vmem:[%s2608_s7 + $0x48] sm:$0xff] }
 0x249   : > { %v955_v38 = vadd.f32 %v954_v33, %v874_v37 }
 0x24a   : > { %v1682_v34 = vmul.f32 -1.442695, %v960_v32 }
 0x24c   : > { %2012 = vpow2.f32 %v1682_v34 }
 0x256   : > { %v2013_v35 = vpop.eup %2012 }
 0x257   : > { %v966_v36 = vadd.f32 1.0, %v2013_v35 }
 0x259   : > { %2014 = vrcp.f32 %v966_v36  ;;  %v1304_v36 = vld [vmem:[%s2608_s7 + $0x40] sm:$0xff] }
 0x263   : > { %v2015_v39 = vpop.eup %2014 }
 0x264   : > { %v969_v40 = vmul.f32 %v2015_v39, %v955_v38  ;;  %v1307_v39 = vld [vmem:[%s2608_s7 + $0x58] sm:$0xff] }
 0x266   : > { %1816 = vmatpush3.msra.mxu1 %v969_v40 }
 0x267   : > { %1818 = vmatmul.mubr.msk.f32.vlgmr.msra.gmra.mrb[2].mxu1 %vm881_vm0, %v970_v41 }
 0x33a   : > { %v1046_v43 = vpop.f32.mrb[2].mxu1 }
 0x33b   : > { %v2343_v44 = vadd.f32 %v1046_v43, %v975_v42  ;;  %v1819_v45 = vpop.f32.mrb[3].mxu1 }
 0x33c   : > { %v1306_v45 = vld [vmem:[%s2608_s7 + $0x50] sm:$0xff] }
 0x33d   : > { %1050 = vxpose.xlu1.b32.start.end [1/1] (short) %v2343_v44, 128  ;;  %1820 = vmatprep.subr.msk.mxu1 %vm1131_vm2, %v2343_v44 }
 0x33e   : > { %1821 = vmatpush3.msk.msra.mxu1 %vm1131_vm2, %v2343_v44 }
 0x3bd   : > { %v1066_v46 = vpop.trf.xlu1 }
 0x3be   : > { %1822 = vmatprep.mubr.msk.f32.mxu1 %vm1082_vm3, %v1066_v46 }
 0x3c1   : > { %v1067_v47 = vpop.trf.xlu1 }
 0x3c2   : > { %1823 = vmatmul.mubr.msk.f32.vlgmr.msra.gmra.mrb[4].mxu1 %vm1082_vm3, %v1067_v47 }
 0x3c5   : > { %v1068_v48 = vpop.trf.xlu1 }
 0x3c6   : > { %1825 = vmatprep.mubr.msk.f32.mxu1 %vm1082_vm3, %v1068_v48  ;;  %v1309_v48 = vld [vmem:[%s2608_s7 + $0x68] sm:$0xff] }
 0x3c9   : > { %v1069_v49 = vpop.trf.xlu1 }
 0x3ca   : > { %1826 = vmatmul.mubr.msk.f32.gmra.mrb[6].mxu1 %vm1082_vm3, %v1069_v49 }
 0x3cd   : > { %v1070_v50 = vpop.trf.xlu1 }
 0x3ce   : > { %1828 = vmatprep.mubr.msk.f32.mxu1 %vm1082_vm3, %v1070_v50 }
 0x3d1   : > { %v1071_v51 = vpop.trf.xlu1 }
 0x3d2   : > { %1829 = vmatmul.mubr.msk.f32.gmra.mrb[8].mxu1 %vm1082_vm3, %v1071_v51 }
 0x3d5   : > { %v1072_v52 = vpop.trf.xlu1 }
 0x3d6   : > { %1831 = vmatprep.mubr.msk.f32.mxu1 %vm1082_vm3, %v1072_v52  ;;  %v1308_v52 = vld [vmem:[%s2608_s7 + $0x60] sm:$0xff] }
 0x3d9   : > { %v1073_v53 = vpop.trf.xlu1 }
 0x3da   : > { %1832 = vmatmul.mubr.msk.f32.gmra.mrb[10].mxu1 %vm1082_vm3, %v1073_v53 }
 0x3dd   : > { %v1074_v54 = vpop.trf.xlu1 }
 0x3de   : > { %1834 = vmatprep.mubr.msk.f32.mxu1 %vm1082_vm3, %v1074_v54 }
 0x3e1   : > { %v1075_v55 = vpop.trf.xlu1 }
 0x3e2   : > { %1835 = vmatmul.mubr.msk.f32.gmra.mrb[12].mxu1 %vm1082_vm3, %v1075_v55 }
 0x3e5   : > { %v1076_v56 = vpop.trf.xlu1 }
 0x3e6   : > { %1837 = vmatprep.mubr.msk.f32.mxu1 %vm1082_vm3, %v1076_v56 }
 0x3e9   : > { %v1077_v57 = vpop.trf.xlu1 }
 0x3ea   : > { %1838 = vmatmul.mubr.msk.f32.gmra.mrb[14].mxu1 %vm1082_vm3, %v1077_v57  ;;  %v1310_v57 = vld [vmem:[%s2608_s7 + $0x70] sm:$0xff] }
 0x3ed   : > { %v1078_v58 = vpop.trf.xlu1 }
 0x3ee   : > { %1840 = vmatprep.mubr.msk.f32.mxu1 %vm1082_vm3, %v1078_v58 }
 0x3f1   : > { %v1079_v59 = vpop.trf.xlu1 }
 0x3f2   : > { %1841 = vmatmul.mubr.msk.f32.gmra.mrb[16].mxu1 %vm1082_vm3, %v1079_v59 }
 0x3f5   : > { %v1080_v60 = vpop.trf.xlu1 }
 0x3f6   : > { %1843 = vmatprep.mubr.msk.f32.mxu1 %vm1082_vm3, %v1080_v60  ;;  %v1311_v60 = vld [vmem:[%s2608_s7 + $0x78] sm:$0xff] }
 0x3f9   : > { %v1081_v61 = vpop.trf.xlu1 }
 0x3fa   : > { %1844 = vmatmul.mubr.msk.f32.gmra.mrb[18].mxu1 %vm1082_vm3, %v1081_v61 }
 0x3fb   : > { %1878 = vmatprep.mubr.msk.f32.mxu1 %vm2146_vm1, %v2145_v29 }
 0x495   : > { %v1824_v62 = vpop.f32.mrb[4].mxu1 }
 0x496   : > { %v1201_v63 = vpop.f32.mrb[5].mxu1  ;;  %v1281_v2 = vmul.f32 0.70710677, %v1824_v62 }
 0x497   : > { %v1280_v1 = vmul.f32 0.70710677, %v1201_v63 }
 0x498   : > { %v2376_v6 = vadd.f32 %v1297_v4, %v1281_v2 }
 0x499   : > { %v2370_v3 = vadd.f32 %v1296_v0, %v1280_v1 }
 0x49b   : > { %1328 = vmax.xlane.f32.xlu0 %v2370_v3 }
 0x49d   : > { %v1827_v5 = vpop.f32.mrb[6].mxu1 }
 0x49e   : > { %v1283_v8 = vmul.f32 0.70710677, %v1827_v5  ;;  %v1211_v9 = vpop.f32.mrb[7].mxu1 }
 0x49f   : > { %v1282_v11 = vmul.f32 0.70710677, %v1211_v9  ;;  %1330 = vmax.xlane.f32.xlu0 %v2376_v6 }
 0x4a0   : > { %v2385_v12 = vadd.f32 %v1299_v7, %v1283_v8 }
 0x4a1   : > { %v2387_v13 = vadd.f32 %v1298_v10, %v1282_v11 }
 0x4a2   : > { %1334 = vmax.xlane.f32.xlu1 %v2385_v12 }
 0x4a3   : > { %1332 = vmax.xlane.f32.xlu0 %v2387_v13 }
 0x4a5   : > { %v1830_v14 = vpop.f32.mrb[8].mxu1 }
 0x4a6   : > { %v1285_v16 = vmul.f32 0.70710677, %v1830_v14  ;;  %v1221_v17 = vpop.f32.mrb[9].mxu1 }
 0x4a7   : > { %v1284_v18 = vmul.f32 0.70710677, %v1221_v17 }
 0x4a8   : > { %v2394_v19 = vadd.f32 %v1301_v15, %v1285_v16 }
 0x4a9   : > { %v2400_v21 = vadd.f32 %v1300_v20, %v1284_v18 }
 0x4aa   : > { %1338 = vmax.xlane.f32.xlu0 %v2394_v19 }
 0x4ad   : > { %v1833_v22 = vpop.f32.mrb[10].mxu1 }
 0x4ae   : > { %v1287_v24 = vmul.f32 0.70710677, %v1833_v22  ;;  %1336 = vmax.xlane.f32.xlu0 %v2400_v21  ;;  %v1231_v25 = vpop.f32.mrb[11].mxu1 }
 0x4af   : > { %v1286_v26 = vmul.f32 0.70710677, %v1231_v25 }
 0x4b0   : > { %v2406_v27 = vadd.f32 %v1303_v23, %v1287_v24 }
 0x4b1   : > { %v2412_v29 = vadd.f32 %v1302_v28, %v1286_v26 }
 0x4b2   : > { %1342 = vmax.xlane.f32.xlu0 %v2406_v27 }
 0x4b5   : > { %v1836_v30 = vpop.f32.mrb[12].mxu1 }
 0x4b6   : > { %v1289_v32 = vmul.f32 0.70710677, %v1836_v30  ;;  %1340 = vmax.xlane.f32.xlu0 %v2412_v29  ;;  %v1241_v33 = vpop.f32.mrb[13].mxu1 }
 0x4b7   : > { %v1288_v34 = vmul.f32 0.70710677, %v1241_v33 }
 0x4b8   : > { %v2418_v35 = vadd.f32 %v1305_v31, %v1289_v32 }
 0x4b9   : > { %v2424_v37 = vadd.f32 %v1304_v36, %v1288_v34 }
 0x4ba   : > { %1346 = vmax.xlane.f32.xlu0 %v2418_v35 }
 0x4bd   : > { %v1839_v38 = vpop.f32.mrb[14].mxu1 }
 0x4be   : > { %v1291_v40 = vmul.f32 0.70710677, %v1839_v38  ;;  %1344 = vmax.xlane.f32.xlu0 %v2424_v37  ;;  %v1251_v41 = vpop.f32.mrb[15].mxu1 }
 0x4bf   : > { %v1290_v42 = vmul.f32 0.70710677, %v1251_v41 }
 0x4c0   : > { %v2430_v43 = vadd.f32 %v1307_v39, %v1291_v40 }
 0x4c1   : > { %v2436_v46 = vadd.f32 %v1306_v45, %v1290_v42 }
 0x4c2   : > { %1350 = vmax.xlane.f32.xlu0 %v2430_v43 }
 0x4c5   : > { %v1842_v47 = vpop.f32.mrb[16].mxu1 }
 0x4c6   : > { %v1293_v49 = vmul.f32 0.70710677, %v1842_v47  ;;  %1348 = vmax.xlane.f32.xlu0 %v2436_v46  ;;  %v1261_v50 = vpop.f32.mrb[17].mxu1 }
 0x4c7   : > { %v1292_v51 = vmul.f32 0.70710677, %v1261_v50 }
 0x4c8   : > { %v2445_v53 = vadd.f32 %v1309_v48, %v1293_v49 }
 0x4c9   : > { %v2448_v54 = vadd.f32 %v1308_v52, %v1292_v51 }
 0x4ca   : > { %1354 = vmax.xlane.f32.xlu0 %v2445_v53 }
 0x4cd   : > { %v1845_v55 = vpop.f32.mrb[18].mxu1 }
 0x4ce   : > { %1352 = vmax.xlane.f32.xlu0 %v2448_v54  ;;  %v1271_v56 = vpop.f32.mrb[19].mxu1  ;;  %v1295_v58 = vmul.f32 0.70710677, %v1845_v55 }
 0x4cf   : > { %v1294_v59 = vmul.f32 0.70710677, %v1271_v56 }
 0x4d0   : > { %v2460_v62 = vadd.f32 %v1311_v60, %v1295_v58 }
 0x4d1   : > { %v2457_v61 = vadd.f32 %v1310_v57, %v1294_v59 }
 0x4d3   : > { %1356 = vmax.xlane.f32.xlu0 %v2457_v61 }
 0x4d7   : > { %1358 = vmax.xlane.f32.xlu0 %v2460_v62 }
 0x528   : > { %v1329_v63 = vpop.xlane.xlu0 %1328 }
 0x529   : > { %v1360_v1 = vsub.f32 %v2370_v3, %v1329_v63 }
 0x52b   : > { %v1376_v7 = vmul.f32 1.442695, %v1360_v1 }
 0x52c   : > { %v1331_v0 = vpop.xlane.xlu0 %1330 }
 0x52d   : > { %v1361_v2 = vsub.f32 %v2376_v6, %v1331_v0 }
 0x52f   : > { %v1378_v4 = vmul.f32 1.442695, %v1361_v2  ;;  %v1335_v5 = vpop.xlane.xlu1 %1334 }
 0x530   : > { %v1363_v8 = vsub.f32 %v2385_v12, %v1335_v5  ;;  %v1333_v9 = vpop.xlane.xlu0 %1332 }
 0x531   : > { %2016 = vpow2.f32 %v1378_v4  ;;  %v1362_v11 = vsub.f32 %v2387_v13, %v1333_v9 }
 0x532   : > { %2018 = vpow2.f32 %v1376_v7  ;;  %v1382_v10 = vmul.f32 1.442695, %v1363_v8 }
 0x533   : > { %v1380_v15 = vmul.f32 1.442695, %v1362_v11 }
 0x534   : > { %2020 = vpow2.f32 %v1382_v10 }
 0x535   : > { %2022 = vpow2.f32 %v1380_v15 }
 0x537   : > { %v1339_v14 = vpop.xlane.xlu0 %1338 }
 0x538   : > { %v1365_v16 = vsub.f32 %v2394_v19, %v1339_v14 }
 0x53a   : > { %v1386_v6 = vmul.f32 1.442695, %v1365_v16 }
 0x53b   : > { %v2468_v17 = vpop.eup %2016  ;;  %v1337_v3 = vpop.xlane.xlu0 %1336 }
 0x53c   : > { %1410 = vadd.xlane.f32.xlu0 %v2468_v17  ;;  %v1364_v18 = vsub.f32 %v2400_v21, %v1337_v3  ;;  %v2472_v12 = vpop.eup %2018  ;;  %2024 = vpow2.f32 %v1386_v6 }
 0x53e   : > { %v1384_v13 = vmul.f32 1.442695, %v1364_v18  ;;  %v2476_v23 = vpop.eup %2020 }
 0x53f   : > { %v1343_v20 = vpop.xlane.xlu0 %1342  ;;  %v2480_v26 = vpop.eup %2022 }
 0x540   : > { %1408 = vadd.xlane.f32.xlu0 %v2472_v12  ;;  %v1367_v22 = vsub.f32 %v2406_v27, %v1343_v20  ;;  %2026 = vpow2.f32 %v1384_v13 }
 0x542   : > { %v1390_v24 = vmul.f32 1.442695, %v1367_v22 }
 0x543   : > { %v1341_v19 = vpop.xlane.xlu0 %1340 }
 0x544   : > { %1414 = vadd.xlane.f32.xlu0 %v2476_v23  ;;  %v1366_v25 = vsub.f32 %v2412_v29, %v1341_v19  ;;  %2028 = vpow2.f32 %v1390_v24 }
 0x546   : > { %v1388_v28 = vmul.f32 1.442695, %v1366_v25  ;;  %v2484_v31 = vpop.eup %2024 }
 0x547   : > { %v1347_v21 = vpop.xlane.xlu0 %1346 }
 0x548   : > { %1412 = vadd.xlane.f32.xlu0 %v2480_v26  ;;  %v1369_v30 = vsub.f32 %v2418_v35, %v1347_v21  ;;  %2030 = vpow2.f32 %v1388_v28 }
 0x54a   : > { %v1394_v32 = vmul.f32 1.442695, %v1369_v30  ;;  %v2488_v34 = vpop.eup %2026 }
 0x54b   : > { %v1345_v27 = vpop.xlane.xlu0 %1344 }
 0x54c   : > { %1418 = vadd.xlane.f32.xlu0 %v2484_v31  ;;  %v1368_v33 = vsub.f32 %v2424_v37, %v1345_v27  ;;  %2032 = vpow2.f32 %v1394_v32 }
 0x54e   : > { %v1392_v36 = vmul.f32 1.442695, %v1368_v33  ;;  %v2491_v38 = vpop.eup %2028 }
 0x54f   : > { %v1351_v29 = vpop.xlane.xlu0 %1350 }
 0x550   : > { %1416 = vadd.xlane.f32.xlu0 %v2488_v34  ;;  %2034 = vpow2.f32 %v1392_v36  ;;  %v1371_v40 = vsub.f32 %v2430_v43, %v1351_v29 }
 0x552   : > { %v2496_v42 = vpop.eup %2030  ;;  %v1398_v47 = vmul.f32 1.442695, %v1371_v40 }
 0x553   : > { %v1349_v39 = vpop.xlane.xlu0 %1348 }
 0x554   : > { %v1370_v35 = vsub.f32 %v2436_v46, %v1349_v39  ;;  %1422 = vadd.xlane.f32.xlu0 %v2491_v38  ;;  %v2147_v46 = vmov 0.0|0.0  }
 0x555   : > { %1881 = vmatprep.subr.bf16.mxu1 %v2147_v46 }
 0x556   : > { %v1396_v41 = vmul.f32 1.442695, %v1370_v35  ;;  %v2500_v49 = vpop.eup %2032 }
 0x557   : > { %v1355_v37 = vpop.xlane.xlu0 %1354 }
 0x558   : > { %2036 = vpow2.f32 %v1396_v41  ;;  %v1373_v45 = vsub.f32 %v2445_v53, %v1355_v37  ;;  %1420 = vadd.xlane.f32.xlu0 %v2496_v42 }
 0x55a   : > { %v1402_v48 = vmul.f32 1.442695, %v1373_v45  ;;  %v2505_v52 = vpop.eup %2034 }
 0x55b   : > { %v1353_v50 = vpop.xlane.xlu0 %1352 }
 0x55c   : > { %2038 = vpow2.f32 %v1402_v48  ;;  %v1372_v43 = vsub.f32 %v2448_v54, %v1353_v50  ;;  %1426 = vadd.xlane.f32.xlu0 %v2500_v49 }
 0x55d   : > { %2040 = vpow2.f32 %v1398_v47 }
 0x55e   : > { %v1400_v51 = vmul.f32 1.442695, %v1372_v43 }
 0x560   : > { %2042 = vpow2.f32 %v1400_v51  ;;  %1424 = vadd.xlane.f32.xlu0 %v2505_v52  ;;  %v1357_v53 = vpop.xlane.xlu0 %1356 }
 0x561   : > { %v1374_v55 = vsub.f32 %v2457_v61, %v1357_v53 }
 0x562   : > { %v2509_v56 = vpop.eup %2036 }
 0x563   : > { %v1404_v57 = vmul.f32 1.442695, %v1374_v55 }
 0x564   : > { %1428 = vadd.xlane.f32.xlu0 %v2509_v56  ;;  %v1359_v58 = vpop.xlane.xlu0 %1358 }
 0x565   : > { %2044 = vpow2.f32 %v1404_v57  ;;  %v1375_v54 = vsub.f32 %v2460_v62, %v1359_v58 }
 0x566   : > { %v2513_v59 = vpop.eup %2038 }
 0x567   : > { %v2515_v60 = vpop.eup %2040  ;;  %v1406_v63 = vmul.f32 1.442695, %v1375_v54  ;;  %1434 = vadd.xlane.f32.xlu1 %v2513_v59 }
 0x568   : > { %1430 = vadd.xlane.f32.xlu0 %v2515_v60 }
 0x569   : > { %2046 = vpow2.f32 %v1406_v63 }
 0x56a   : > { %v2519_v61 = vpop.eup %2042 }
 0x56c   : > { %1432 = vadd.xlane.f32.xlu0 %v2519_v61 }
 0x56f   : > { %v2522_v0 = vpop.eup %2044 }
 0x570   : > { %1436 = vadd.xlane.f32.xlu0 %v2522_v0 }
 0x573   : > { %v2525_v1 = vpop.eup %2046 }
 0x574   : > { %1438 = vadd.xlane.f32.xlu1 %v2525_v1 }
 0x5c9   : > { %v1411_v62 = vpop.xlane.xlu0 %1410 }
 0x5ca   : > { %2048 = vrcp.f32 %v1411_v62 }
 0x5cd   : > { %v1409_v2 = vpop.xlane.xlu0 %1408 }
 0x5ce   : > { %2050 = vrcp.f32 %v1409_v2 }
 0x5d1   : > { %v1415_v4 = vpop.xlane.xlu0 %1414 }
 0x5d2   : > { %2052 = vrcp.f32 %v1415_v4 }
 0x5d4   : > { %v2049_v7 = vpop.eup %2048 }
 0x5d5   : > { %v1413_v5 = vpop.xlane.xlu0 %1412  ;;  %v1457_v11 = vmul.f32 %v2049_v7, %v2468_v17 }
 0x5d6   : > { %2054 = vrcp.f32 %v1413_v5 }
 0x5d8   : > { %v2051_v8 = vpop.eup %2050 }
 0x5d9   : > { %v1419_v9 = vpop.xlane.xlu0 %1418  ;;  %v1456_v10 = vmul.f32 %v2051_v8, %v2472_v12 }
 0x5da   : > { %2056 = vrcp.f32 %v1419_v9 }
 0x5db   : > { %v1882_v14 = vpack.c.bf16 %v1457_v11, %v1456_v10 }
 0x5dc   : > { %v2053_v16 = vpop.eup %2052 }
 0x5dd   : > { %1883 = vmatpush3.bf16.xpose.msra.mxu1 %v1882_v14  ;;  %v1417_v15 = vpop.xlane.xlu0 %1416  ;;  %v1459_v20 = vmul.f32 %v2053_v16, %v2476_v23 }
 0x5de   : > { %2058 = vrcp.f32 %v1417_v15  ;;  %1884 = vmatprep.subr.bf16.mxu1 %v2147_v46 }
 0x5e0   : > { %v2055_v3 = vpop.eup %2054 }
 0x5e1   : > { %v1423_v6 = vpop.xlane.xlu0 %1422  ;;  %v1458_v18 = vmul.f32 %v2055_v3, %v2480_v26 }
 0x5e2   : > { %2060 = vrcp.f32 %v1423_v6 }
 0x5e3   : > { %v1885_v13 = vpack.c.bf16 %v1459_v20, %v1458_v18 }
 0x5e4   : > { %v2057_v22 = vpop.eup %2056 }
 0x5e5   : > { %1886 = vmatpush3.bf16.xpose.msra.mxu1 %v1885_v13  ;;  %v1421_v12 = vpop.xlane.xlu0 %1420  ;;  %v1461_v25 = vmul.f32 %v2057_v22, %v2484_v31 }
 0x5e6   : > { %2062 = vrcp.f32 %v1421_v12  ;;  %1887 = vmatprep.subr.bf16.mxu1 %v2147_v46 }
 0x5e8   : > { %v2059_v17 = vpop.eup %2058 }
 0x5e9   : > { %v1427_v19 = vpop.xlane.xlu0 %1426  ;;  %v1460_v24 = vmul.f32 %v2059_v17, %v2488_v34 }
 0x5ea   : > { %2064 = vrcp.f32 %v1427_v19 }
 0x5eb   : > { %v1888_v21 = vpack.c.bf16 %v1461_v25, %v1460_v24 }
 0x5ec   : > { %v2061_v28 = vpop.eup %2060 }
 0x5ed   : > { %1889 = vmatpush3.bf16.xpose.msra.mxu1 %v1888_v21  ;;  %v1425_v26 = vpop.xlane.xlu0 %1424  ;;  %v1463_v32 = vmul.f32 %v2061_v28, %v2491_v38 }
 0x5ee   : > { %2066 = vrcp.f32 %v1425_v26  ;;  %1890 = vmatprep.subr.bf16.mxu1 %v2147_v46 }
 0x5f0   : > { %v2063_v23 = vpop.eup %2062 }
 0x5f1   : > { %v1429_v30 = vpop.xlane.xlu0 %1428  ;;  %v1462_v27 = vmul.f32 %v2063_v23, %v2496_v42 }
 0x5f2   : > { %2068 = vrcp.f32 %v1429_v30 }
 0x5f3   : > { %v1891_v33 = vpack.c.bf16 %v1463_v32, %v1462_v27 }
 0x5f4   : > { %v2065_v29 = vpop.eup %2064  ;;  %v1435_v36 = vpop.xlane.xlu1 %1434 }
 0x5f5   : > { %1892 = vmatpush3.bf16.xpose.msra.mxu1 %v1891_v33  ;;  %v1431_v34 = vpop.xlane.xlu0 %1430  ;;  %v1465_v40 = vmul.f32 %v2065_v29, %v2500_v49 }
 0x5f6   : > { %2070 = vrcp.f32 %v1431_v34  ;;  %1893 = vmatprep.subr.bf16.mxu1 %v2147_v46 }
 0x5f8   : > { %v2067_v31 = vpop.eup %2066 }
 0x5f9   : > { %v1433_v39 = vpop.xlane.xlu0 %1432  ;;  %v1464_v35 = vmul.f32 %v2067_v31, %v2505_v52 }
 0x5fa   : > { %2072 = vrcp.f32 %v1433_v39 }
 0x5fb   : > { %v1894_v41 = vpack.c.bf16 %v1465_v40, %v1464_v35  ;;  %2074 = vrcp.f32 %v1435_v36 }
 0x5fc   : > { %v2069_v38 = vpop.eup %2068 }
 0x5fd   : > { %1895 = vmatpush3.bf16.xpose.msra.mxu1 %v1894_v41  ;;  %v1437_v37 = vpop.xlane.xlu0 %1436  ;;  %v1466_v47 = vmul.f32 %v2069_v38, %v2509_v56 }
 0x5fe   : > { %1896 = vmatprep.subr.bf16.mxu1 %v2147_v46 }
 0x600   : > { %v2071_v42 = vpop.eup %2070 }
 0x601   : > { %v1439_v45 = vpop.xlane.xlu1 %1438  ;;  %v1467_v48 = vmul.f32 %v2071_v42, %v2515_v60 }
 0x602   : > { %2076 = vrcp.f32 %v1439_v45 }
 0x603   : > { %v1897_v50 = vpack.c.bf16 %v1467_v48, %v1466_v47  ;;  %2078 = vrcp.f32 %v1437_v37 }
 0x604   : > { %v2073_v43 = vpop.eup %2072 }
 0x605   : > { %1898 = vmatpush3.bf16.xpose.msra.mxu1 %v1897_v50  ;;  %v2075_v49 = vpop.eup %2074  ;;  %v1468_v51 = vmul.f32 %v2073_v43, %v2519_v61 }
 0x606   : > { %1899 = vmatprep.subr.bf16.mxu1 %v2147_v46  ;;  %v1469_v52 = vmul.f32 %v2075_v49, %v2513_v59  ;;  %v1542_v59 = vrot.slane %v2343_v44, 6 }
 0x608   : > { %v1900_v53 = vpack.c.bf16 %v1469_v52, %v1468_v51 }
 0x60c   : > { %v2077_v55 = vpop.eup %2076 }
 0x60d   : > { %1901 = vmatpush3.bf16.xpose.msra.mxu1 %v1900_v53  ;;  %v2079_v56 = vpop.eup %2078  ;;  %v1471_v57 = vmul.f32 %v2077_v55, %v2525_v1 }
 0x60e   : > { %1902 = vmatprep.subr.bf16.mxu1 %v2147_v46  ;;  %v1470_v58 = vmul.f32 %v2079_v56, %v2522_v0 }
 0x610   : > { %v1903_v54 = vpack.c.bf16 %v1471_v57, %v1470_v58 }
 0x615   : > { %1904 = vmatpush3.bf16.xpose.msra.mxu1 %v1903_v54 }
 0x61c   : > { %1879 = vmatmul.mubr.f32.vlgmr.msra.gmra.mrb[20].mxu1 %v2343_v44 }
 0x6ef   : > { %v1538_v60 = vpop.f32.mrb[20].mxu1 }
 0x6f0   : > { %v1544_v46 = vsel %vm1131_vm2, %v1538_v60, %v1542_v59  ;;  %v1880_v63 = vpop.f32.mrb[21].mxu1 }
 0x6f1   : > { %1545 = vst [vmem:[%s298_s20] sm:$0xf] %v1544_v46 }
 0x6f2   : > { %2093 = shalt.err (!%p2090_p3)
}
 0x6f3   : > { %s2094_s17 = scalar_lea.hbm %s2558_s24, 64  ;;  %s2098_s19 = scalar_lea.hbm %s2609_s8, 192 }
 0x6f4   : > { %p2095_p4 = scmp.ne.s32.totalorder %s2558_s24, %s2094_s17  ;;  %p2099_p9 = scmp.lt.u32.totalorder %s2558_s24, %s2609_s8 }
 0x6f5   : > { %p2100_p10 = scmp.lt.u32.totalorder %s2098_s19, %s2094_s17  ;;  %p2102_p12 = scmp.lt.u32.totalorder %s2094_s17, %s2558_s24 }
 0x6f6   : > { %p2096_p7 = pnand %p2095_p4, %p2232_p5 }
 0x6f7   : > { %p2101_p11 = por %p2100_p10, %p2099_p9 }
 0x6f8   : > { %p2097_p8 = pneg %p2096_p7 }
 0x6f9   : > { %p2103_p13 = por %p2102_p12, %p2101_p11 }
 0x6fb   : > { %p2104_p0 = pnand %p2103_p13, %p2097_p8 }
 0x6fd   : > { %2107 = shalt.err (!%p2104_p0)
}
 0x6fe   : > { %1906 = dma.vmem_to_hbm [thread:$0]  (%p2232_p5), %s2560_s21, 64, %s2558_s24, %s1547_s9  }
 0x6ff PF: > { %p1912_p1 = scmp.ge.s32.totalorder %s2142_s30, 2  ;;  %s1572_s23 = sand.u32 1, %s2130_s27  }
 0x700   : > { %s1573_s26 = scalar_lea.sflag [#allocation3], %s1572_s23 }
 0x701   : > { %p1909_p2 = pnand %p1912_p1, %p2236_p6 }
 0x703   : > { %2125 = dma.done.wait (!%p1909_p2), %s1573_s26, 64  }
 0x704   : > { %2127 = vsyncadd (!%p1909_p2), %s1573_s26, 4294967232  ;;  %p18_p3 = scmp.ge.s32.totalorder %s2219_s11, 5   ;;  %s2612_s27 = smov %s2134_s28 }
 0x705   : > { %s2613_s28 = smov %s2138_s29  ;;  %s2614_s29 = smov %s2230_s14 }
 0x706   : > { %s2615_s30 = smov %s2219_s11  ;;  %20 = sbr.rel (!%p18_p3) target bundleno = 3 (0x3), region = 87 }
 0x70d   :  { %1578 = vsyncpa [#allocation3], 1 }
 0x70e   :  { %1580 = vsyncpa [#allocation3 + $0x1], 1 }

</bundles_post_ra>
